<compile_context>
chip_gen: v7x
topology: tpu7x:2x2x1
jax: 0.10.0
libtpu: 0.0.40
codegen_flags: <defaults>
</compile_context>

<pallas_src>
import functools

import jax
import jax.numpy as jnp
from jax.experimental import pallas as pl
from jax.experimental.pallas import tpu as pltpu

LANE = 128
TARGET_TILE_BYTES = 2 * 1024 * 1024   # per-input pipeline buffer (x2 inputs x2 bufs = 8 MiB)


def _round_up(x, m):
    return ((x + m - 1) // m) * m


def _sublane_granularity(dtype):
    # f32 -> 8, bf16 -> 16, int8/fp8 -> 32 (packed sublane tiling).
    return max(8, 32 // jnp.dtype(dtype).itemsize)


def _num_tensorcores_per_chip():
    """Conservative TensorCore count: report 2 only on positively-identified v7x."""
    try:
        kind = jax.devices()[0].device_kind.lower()
    except Exception:
        return 1
    return 2 if ("v7" in kind or "7x" in kind) else 1


def _hinge_diff(pred_ref, label_ref, threshold):
    pred = pred_ref[...].astype(jnp.float32)
    label = label_ref[...].astype(jnp.float32)
    # label <  threshold -> pred' = relu(pred), target = 0      -> diff = relu(pred)
    # label >= threshold -> pred' = pred,       target = label  -> diff = pred - label
    return jnp.where(label < threshold, jnp.maximum(pred, 0.0), pred - label)


def _lbhinge_kernel_1core(pred_ref, label_ref, out_ref, acc_ref, *,
                          threshold, tile_rows, acc_rows, num_tiles,
                          valid_rows, ragged):
    """Single-TensorCore path: resident VMEM accumulator + in-kernel final reduce."""
    t = pl.program_id(0)

    @pl.when(t == 0)
    def _():
        acc_ref[...] = jnp.zeros_like(acc_ref)

    diff = _hinge_diff(pred_ref, label_ref, threshold)

    def _accumulate(d):
        sq = d * d
        # acc_rows independent per-vreg add chains (VPU only); the single
        # cross-lane reduce is deferred to the final grid step below.
        acc_ref[...] += sq.reshape(tile_rows // acc_rows, acc_rows, LANE).sum(axis=0)

    last = num_tiles - 1
    if ragged:
        # Only the edge tile pays iota + cmp + select; interior tiles run clean.
        @pl.when(t < last)
        def _():
            _accumulate(diff)

        @pl.when(t == last)
        def _():
            row = jax.lax.broadcasted_iota(jnp.int32, (tile_rows, LANE), 0)
            # Select (not multiply) BEFORE squaring: edge-block padding may be NaN.
            _accumulate(jnp.where(t * tile_rows + row < valid_rows, diff, 0.0))
    else:
        _accumulate(diff)

    @pl.when(t == last)
    def _():
        # Cross-lane/sublane reduce rides the otherwise-idle XLU slot; leaves
        # only divide (+ optional clip) for the wrapper.
        out_ref[0, 0] = jnp.sum(acc_ref[...])


def _lbhinge_kernel_2core(pred_ref, label_ref, out_ref, *,
                          threshold, tile_rows, acc_rows, tiles_per_core,
                          total_tiles, valid_rows, ragged):
    """Two-TensorCore (v7x) path: per-core resident output block is the accumulator."""
    c = pl.program_id(0)
    t = pl.program_id(1)

    @pl.when(t == 0)
    def _():
        out_ref[...] = jnp.zeros_like(out_ref)

    diff = _hinge_diff(pred_ref, label_ref, threshold)

    def _accumulate(d):
        sq = d * d
        out_ref[...] += sq.reshape(tile_rows // acc_rows, acc_rows, LANE).sum(axis=0)

    if ragged:
        raw = c * tiles_per_core + t
        last = total_tiles - 1

        @pl.when(raw < last)
        def _():
            _accumulate(diff)

        @pl.when(raw >= last)
        def _():
            # Edge tile and/or clamped duplicate tile: mask by global row index
            # (duplicates mask to all-zero), select before squaring.
            row = jax.lax.broadcasted_iota(jnp.int32, (tile_rows, LANE), 0)
            _accumulate(jnp.where(raw * tile_rows + row < valid_rows, diff, 0.0))
    else:
        _accumulate(diff)


def lbhinge_loss(prediction, label, threshold=-100.0, clip=None,
                 num_tensorcores=None):
    """Pallas implementation of LBHinge.forward (target_bb is unused upstream)."""
    assert prediction.shape == label.shape
    n_elems = prediction.size

    p = prediction.reshape(-1)
    l = label.reshape(-1)

    # Only a sub-128 ragged tail forces a pad (zero-padded elements contribute
    # exactly 0 to the SSE for either hinge branch); otherwise reshape is free.
    pad = (-n_elems) % LANE
    if pad:
        p = jnp.pad(p, (0, pad))
        l = jnp.pad(l, (0, pad))
    rows = (n_elems + pad) // LANE
    p = p.reshape(rows, LANE)
    l = l.reshape(rows, LANE)

    # Size tiles by bytes: ~2 MiB per input pipeline buffer (4096 f32 rows,
    # 8192 bf16 rows). 2 inputs x 2 buffers = 8 MiB < scoped-VMEM defaults on
    # v5e/v6e/v7x, so no vmem_limit bump is needed.
    gran = max(_sublane_granularity(p.dtype), _sublane_granularity(l.dtype))
    itemsize = max(jnp.dtype(p.dtype).itemsize, jnp.dtype(l.dtype).itemsize)
    max_tile_rows = max(gran, (TARGET_TILE_BYTES // (LANE * itemsize)) // gran * gran)
    tile_rows = min(max_tile_rows, _round_up(rows, gran))

    # Widest accumulator (<=64 rows) that divides the tile: 8 independent vadd
    # chains for big tiles, gracefully degrading for small inputs.
    acc_rows = 64
    while tile_rows % acc_rows:
        acc_rows //= 2

    total_tiles = pl.cdiv(rows, tile_rows)
    threshold = float(threshold)

    cores = (_num_tensorcores_per_chip() if num_tensorcores is None
             else int(num_tensorcores))

    if cores >= 2 and total_tiles >= 2:
        # v7x: explicit 2-way TensorCore split of the reduction.
        shards = 2
        tiles_per_core = pl.cdiv(total_tiles, shards)
        ragged = (shards * tiles_per_core * tile_rows != rows)
        last_tile = total_tiles - 1
        if ragged:
            # Clamp so the DMA window stays inside the array; the in-kernel row
            # mask zeroes duplicated / out-of-range rows.
            in_map = lambda c, t: (jnp.minimum(c * tiles_per_core + t, last_tile), 0)
        else:
            in_map = lambda c, t: (c * tiles_per_core + t, 0)

        kernel = functools.partial(
            _lbhinge_kernel_2core,
            threshold=threshold, tile_rows=tile_rows, acc_rows=acc_rows,
            tiles_per_core=tiles_per_core, total_tiles=total_tiles,
            valid_rows=rows, ragged=ragged)

        partials = pl.pallas_call(
            kernel,
            out_shape=jax.ShapeDtypeStruct((shards, acc_rows, LANE), jnp.float32),
            grid_spec=pltpu.PrefetchScalarGridSpec(
                num_scalar_prefetch=0,
                grid=(shards, tiles_per_core),
                in_specs=[pl.BlockSpec((tile_rows, LANE), in_map),
                          pl.BlockSpec((tile_rows, LANE), in_map)],
                # Leading dim squeezed: each core accumulates into its own
                # resident lane-dense (acc_rows, 128) block.
                out_specs=pl.BlockSpec((None, acc_rows, LANE),
                                       lambda c, t: (c, 0, 0)),
            ),
            compiler_params=pltpu.CompilerParams(
                dimension_semantics=(pltpu.CORE_PARALLEL, pltpu.ARBITRARY)),
        )(p, l)
        total = jnp.sum(partials)
    else:
        # v5e / v6e (single TC) or tiny inputs: serial reduction, scalar output.
        ragged = (total_tiles * tile_rows != rows)
        kernel = functools.partial(
            _lbhinge_kernel_1core,
            threshold=threshold, tile_rows=tile_rows, acc_rows=acc_rows,
            num_tiles=total_tiles, valid_rows=rows, ragged=ragged)

        total = pl.pallas_call(
            kernel,
            out_shape=jax.ShapeDtypeStruct((1, 1), jnp.float32),
            grid_spec=pltpu.PrefetchScalarGridSpec(
                num_scalar_prefetch=0,
                grid=(total_tiles,),
                in_specs=[pl.BlockSpec((tile_rows, LANE), lambda t: (t, 0)),
                          pl.BlockSpec((tile_rows, LANE), lambda t: (t, 0))],
                out_specs=pl.BlockSpec(memory_space=pltpu.MemorySpace.SMEM),
                scratch_shapes=[pltpu.VMEM((acc_rows, LANE), jnp.float32)],
            ),
            compiler_params=pltpu.CompilerParams(
                dimension_semantics=("arbitrary",)),
        )(p, l)[0, 0]

    loss = total / jnp.float32(n_elems)
    if clip is not None:
        loss = jnp.minimum(loss, jnp.float32(clip))
    return loss


def lbhinge_ref(prediction, label, threshold=-100.0, clip=None):
    """Pure-JAX reference mirroring the PyTorch forward."""
    prediction = prediction.astype(jnp.float32)
    label = label.astype(jnp.float32)
    negative_mask = (label < threshold).astype(jnp.float32)
    positive_mask = 1.0 - negative_mask
    pred_h = negative_mask * jax.nn.relu(prediction) + positive_mask * prediction
    loss = jnp.mean((pred_h - positive_mask * label) ** 2)
    if clip is not None:
        loss = jnp.minimum(loss, jnp.float32(clip))
    return loss


if __name__ == "__main__":
    key = jax.random.PRNGKey(0)
    kp, kl, kp2, kl2 = jax.random.split(key, 4)

    # Case 1: typical pytracking NCHW classification score maps, no clip.
    shape = (2, 4, 16, 16)
    prediction = jax.random.normal(kp, shape, dtype=jnp.float32)
    label = jax.random.uniform(kl, shape, dtype=jnp.float32,
                               minval=-0.2, maxval=1.0)
    out = jax.block_until_ready(lbhinge_loss(prediction, label, threshold=0.05))
    ref = lbhinge_ref(prediction, label, threshold=0.05)
    assert jnp.allclose(out, ref, rtol=1e-5, atol=1e-6), (out, ref)

    # Case 2: ragged element count (exercises lane pad + edge-row mask) + clip.
    shape2 = (2, 1, 18, 23)
    prediction2 = jax.random.normal(kp2, shape2, dtype=jnp.float32)
    label2 = jax.random.uniform(kl2, shape2, dtype=jnp.float32,
                                minval=-0.2, maxval=1.0)
    out2 = jax.block_until_ready(
        lbhinge_loss(prediction2, label2, threshold=0.05, clip=0.25))
    ref2 = lbhinge_ref(prediction2, label2, threshold=0.05, clip=0.25)
    assert jnp.allclose(out2, ref2, rtol=1e-5, atol=1e-6), (out2, ref2)

    print("KERNEL_OK")
</pallas_src>

<mosaic_0001>
module attributes {stable_mosaic.version = 11 : i64} {
  func.func @_lbhinge_kernel_1core(%arg0: i32, %arg1: memref<16x128xf32, #tpu.memory_space<vmem>>, %arg2: memref<16x128xf32, #tpu.memory_space<vmem>>, %arg3: memref<1x1xf32, #tpu.memory_space<smem>>, %arg4: memref<16x128xf32, #tpu.memory_space<vmem>>) attributes {dimension_semantics = [#tpu.dimension_semantics<arbitrary>], iteration_bounds = array<i64: 1>, scalar_prefetch = 0 : i64, scratch_operands = 1 : i64, tpu.core_type = #tpu.core_type<tc>, window_params = [{transform_indices = @transform_0, window_bounds = array<i64: 16, 128>}, {transform_indices = @transform_1, window_bounds = array<i64: 16, 128>}, {transform_indices = @transform_2, window_bounds = array<i64: 1, 1>}]} {
    %c0_i32 = arith.constant 0 : i32
    %0 = arith.cmpi eq, %arg0, %c0_i32 : i32
    %1 = arith.extui %0 : i1 to i32
    %c0_i32_0 = arith.constant 0 : i32
    %2 = arith.cmpi ne, %1, %c0_i32_0 : i32
    scf.if %2 {
      %cst_12 = arith.constant 0.000000e+00 : f32
      %20 = vector.broadcast %cst_12 : f32 to vector<16x128xf32>
      %c0_13 = arith.constant 0 : index
      %c0_14 = arith.constant 0 : index
      %21 = vector.load %arg4[%c0_13, %c0_14] : memref<16x128xf32, #tpu.memory_space<vmem>>, vector<16x128xf32>
      tpu.vector_store %arg4[%c0_13, %c0_14], %20 {strides = array<i32>} : memref<16x128xf32, #tpu.memory_space<vmem>>, vector<16x128xf32>,
    } else {
    }
    %c0 = arith.constant 0 : index
    %c0_1 = arith.constant 0 : index
    %3 = vector.load %arg1[%c0, %c0_1] : memref<16x128xf32, #tpu.memory_space<vmem>>, vector<16x128xf32>
    %c0_2 = arith.constant 0 : index
    %c0_3 = arith.constant 0 : index
    %4 = vector.load %arg2[%c0_2, %c0_3] : memref<16x128xf32, #tpu.memory_space<vmem>>, vector<16x128xf32>
    %cst = arith.constant 5.000000e-02 : f32
    %5 = vector.broadcast %cst : f32 to vector<16x128xf32>
    %6 = arith.cmpf olt, %4, %5 : vector<16x128xf32>
    %cst_4 = arith.constant 0.000000e+00 : f32
    %7 = vector.broadcast %cst_4 : f32 to vector<16x128xf32>
    %8 = arith.maximumf %3, %7 : vector<16x128xf32>
    %9 = arith.subf %3, %4 : vector<16x128xf32>
    %10 = arith.select %6, %8, %9 : vector<16x128xi1>, vector<16x128xf32>
    %11 = arith.mulf %10, %10 : vector<16x128xf32>
    %c0_5 = arith.constant 0 : index
    %c0_6 = arith.constant 0 : index
    %12 = vector.load %arg4[%c0_5, %c0_6] : memref<16x128xf32, #tpu.memory_space<vmem>>, vector<16x128xf32>
    %13 = vector.shape_cast %11 : vector<16x128xf32> to vector<1x16x128xf32>
    %cst_7 = arith.constant dense<0.000000e+00> : vector<16x128xf32>
    %14 = vector.multi_reduction <add>, %13, %cst_7 [0] : vector<1x16x128xf32> to vector<16x128xf32>
    %15 = arith.addf %12, %14 : vector<16x128xf32>
    %c0_8 = arith.constant 0 : index
    %c0_9 = arith.constant 0 : index
    %16 = vector.load %arg4[%c0_8, %c0_9] : memref<16x128xf32, #tpu.memory_space<vmem>>, vector<16x128xf32>
    tpu.vector_store %arg4[%c0_8, %c0_9], %15 {strides = array<i32>} : memref<16x128xf32, #tpu.memory_space<vmem>>, vector<16x128xf32>,
    %c0_i32_10 = arith.constant 0 : i32
    %17 = arith.cmpi eq, %arg0, %c0_i32_10 : i32
    %18 = arith.extui %17 : i1 to i32
    %c0_i32_11 = arith.constant 0 : i32
    %19 = arith.cmpi ne, %18, %c0_i32_11 : i32
    scf.if %19 {
      %c0_12 = arith.constant 0 : index
      %c0_13 = arith.constant 0 : index
      %20 = vector.load %arg4[%c0_12, %c0_13] : memref<16x128xf32, #tpu.memory_space<vmem>>, vector<16x128xf32>
      %21 = vector.shape_cast %20 : vector<16x128xf32> to vector<1x16x128xf32>
      %cst_14 = arith.constant dense<0.000000e+00> : vector<1xf32>
      %22 = vector.multi_reduction <add>, %21, %cst_14 [1, 2] : vector<1x16x128xf32> to vector<1xf32>
      %23 = vector.shape_cast %22 : vector<1xf32> to vector<1x1x1xf32>
      %24 = vector.extract %23[0, 0, 0] : f32 from vector<1x1x1xf32>
      %c0_15 = arith.constant 0 : index
      %c0_16 = arith.constant 0 : index
      %25 = memref.load %arg3[%c0_15, %c0_16] : memref<1x1xf32, #tpu.memory_space<smem>>
      memref.store %24, %arg3[%c0_15, %c0_16] : memref<1x1xf32, #tpu.memory_space<smem>>
    } else {
    }
    return
  }
  func.func @transform_0(%arg0: i32) -> (i32, i32) {
    %c0_i32 = arith.constant 0 : i32
    %c0_i32_0 = arith.constant 0 : i32
    return %arg0, %c0_i32 : i32, i32
  }
  func.func @transform_1(%arg0: i32) -> (i32, i32) {
    %c0_i32 = arith.constant 0 : i32
    %c0_i32_0 = arith.constant 0 : i32
    return %arg0, %c0_i32 : i32, i32
  }
  func.func @transform_2(%arg0: i32) -> (i32, i32) {
    %c0_i32 = arith.constant 0 : i32
    %c0_i32_0 = arith.constant 0 : i32
    %c0_i32_1 = arith.constant 0 : i32
    return %c0_i32, %c0_i32_0 : i32, i32
  }
}

</mosaic_0001>

<bundles_post_ra>
// kernel: tpu_custom_call.1
= control target key start
LH: loop header
LB: loop body
LE: loop exit
PB: predicated region body
PF: predicated region fallthrough
CT: control target
= control target key end

     0   :  { %7 = vsyncpa [#allocation4], 0  ;;  %s223_s0 = inlined_call_operand.hbm [shape: f32[16,128], index: 0, kind: input, shape index: {}]   ;;  %s224_s1 = inlined_call_operand.hbm [shape: f32[16,128], index: 1, kind: input, shape index: {}]   ;;  %s225_s2 = inlined_call_operand.hbm [shape: f32[1,1], index: 2, kind: output, shape index: {}]  }
   0x1   :  { %8 = vsyncpa [#allocation7], 0 }
   0x2   :  { %9 = vsyncpa [#allocation5], 0  ;;  %s167_s9 = smov [#allocation3]   ;;  %s107_s13 = scalar_lea.hbm %s223_s0, 256 }
   0x3   :  { %s15_s10 = sshll.u32 %s167_s9, 4  ;;  %p108_p0 = scmp.ne.s32.totalorder %s223_s0, %s107_s13  ;;  %s16_s10 = int_to_ptr.vmem [resolvable:$true] %s15_s10 }
   0x4   :  { %p111_p1 = scmp.lt.u32.totalorder %s107_s13, %s223_s0 }
   0x6   :  { %p113_p2 = pnand %p111_p1, %p108_p0 }
   0x8   :  { %116 = shalt.err (!%p113_p2)
}
   0x9   :  { %s117_s18 = scalar_lea.vmem %s16_s10, 256  ;;  %p122_p4 = scmp.lt.s32.totalorder %s16_s10, %s16_s10 }
   0xa   :  { %p118_p3 = scmp.ne.s32.totalorder %s16_s10, %s117_s18  ;;  %p123_p5 = scmp.lt.s32.totalorder %s117_s18, %s117_s18 }
   0xc   :  { %p124_p6 = por %p123_p5, %p122_p4 }
   0xe   :  { %p125_p7 = pnand %p124_p6, %p118_p3 }
  0x10   :  { %128 = shalt.err (!%p125_p7)
}
  0x11   :  { %s168_s19 = smov 128   ;;  %s169_s20 = smov 8  }
  0x12   :  { %21 = dma.hbm_to_vmem [thread:$0]  %s223_s0, 256, %s16_s10, [#allocation4], %s168_s19, %s168_s19, %s169_s20  }
  0x13   :  { %s170_s23 = smov [#allocation6]   ;;  %s129_s27 = scalar_lea.hbm %s224_s1, 256 }
  0x14   :  { %s27_s24 = sshll.u32 %s170_s23, 4  ;;  %p130_p8 = scmp.ne.s32.totalorder %s224_s1, %s129_s27  ;;  %s28_s24 = int_to_ptr.vmem [resolvable:$true] %s27_s24 }
  0x15   :  { %p133_p9 = scmp.lt.u32.totalorder %s129_s27, %s224_s1 }
  0x17   :  { %p135_p10 = pnand %p133_p9, %p130_p8 }
  0x19   :  { %138 = shalt.err (!%p135_p10)
}
  0x1a   :  { %s139_s4 = scalar_lea.vmem %s28_s24, 256  ;;  %p144_p12 = scmp.lt.s32.totalorder %s28_s24, %s28_s24 }
  0x1b   :  { %p140_p11 = scmp.ne.s32.totalorder %s28_s24, %s139_s4  ;;  %p145_p13 = scmp.lt.s32.totalorder %s139_s4, %s139_s4 }
  0x1d   :  { %p146_p0 = por %p145_p13, %p144_p12 }
  0x1f   :  { %p147_p1 = pnand %p146_p0, %p140_p11 }
  0x21   :  { %150 = shalt.err (!%p147_p1)
}
  0x22   :  { %33 = dma.hbm_to_vmem [thread:$0]  %s224_s1, 256, %s28_s24, [#allocation7], %s168_s19, %s168_s19, %s169_s20  }
  0x23   :  { %161 = dma.done.wait [#allocation4], 256  }
  0x24   :  { %162 = vsyncadd [#allocation4], 4294967040 }
  0x25   :  { %163 = dma.done.wait [#allocation7], 256  }
  0x26   :  { %164 = vsyncadd [#allocation7], 4294967040  ;;  %v46_v0 = vld [vmem:[#allocation3] sm:$0xff]  ;;  %v47_v1 = vld [vmem:[#allocation3 + $0x8] sm:$0xff]  ;;  %s151_s8 = scalar_lea.hbm %s225_s2, 16 }
  0x27   :  { %v48_v2 = vld [vmem:[#allocation6] sm:$0xff]  ;;  %v49_v3 = vld [vmem:[#allocation6 + $0x8] sm:$0xff]  ;;  %v52_v4 = vmax.f32 %v46_v0, 0.0  ;;  %v53_v5 = vmax.f32 %v47_v1, 0.0  ;;  %p152_p2 = scmp.ne.s32.totalorder %s225_s2, %s151_s8  ;;  %p155_p3 = scmp.lt.u32.totalorder %s151_s8, %s225_s2 }
  0x28   :  { %vm50_vm0 = vcmp.lt.f32.partialorder %v48_v2, 0.05  ;;  %v54_v6 = vsub.f32 %v46_v0, %v48_v2  ;;  %vm51_vm1 = vcmp.lt.f32.partialorder %v49_v3, 0.05  ;;  %v55_v7 = vsub.f32 %v47_v1, %v49_v3 }
  0x29   :  { %p157_p4 = pnand %p155_p3, %p152_p2 }
  0x2a   :  { %v56_v8 = vsel %vm50_vm0, %v52_v4, %v54_v6  ;;  %v57_v9 = vsel %vm51_vm1, %v53_v5, %v55_v7 }
  0x2b   :  { %v58_v10 = vmul.f32 %v56_v8, %v56_v8  ;;  %v59_v11 = vmul.f32 %v57_v9, %v57_v9 }
  0x2d   :  { %v73_v12 = vadd.f32 %v59_v11, %v58_v10 }
  0x2f   :  { %74 = vadd.xlane.f32.xlu0 %v73_v12 }
  0xbc   :  { %v75_v13 = vpop.xlane.xlu0 %74 }
  0xbd   :  { %v76_v14 = vrot.slane %v75_v13, 4 }
  0xbf   :  { %v77_v15 = vadd.f32 %v76_v14, %v75_v13 }
  0xc1   :  { %v78_v16 = vrot.slane %v77_v15, 2 }
  0xc3   :  { %v79_v17 = vadd.f32 %v78_v16, %v77_v15 }
  0xc5   :  { %v80_v18 = vrot.slane %v79_v17, 1 }
  0xc7   :  { %v81_v19 = vadd.f32 %v80_v18, %v79_v17 }
  0xc9   :  { %100 = vpush %v81_v19 }
  0xfa   :  { %s101_s1 = spop %100 }
  0xfb   :  { %84 = sst [smem:[#allocation8]] %s101_s1 }
  0xfc   :  { %160 = shalt.err (!%p157_p4)
}
  0xfd   :  { %s171_s13 = smov [#allocation8]  }
  0xfe   :  { %92 = dma.smem_to_hbm %s171_s13, 16, %s225_s2, [#allocation5]  }
  0xff   :  { %165 = dma.done.wait [#allocation5], 16  }
 0x100   :  { %166 = vsyncadd [#allocation5], 4294967280 }
 0x101   :  { %96 = sfence }
 0x102   :  { %97 = vsyncpa [#allocation4], 1 }
 0x103   :  { %98 = vsyncpa [#allocation7], 1 }
 0x104   :  { %99 = vsyncpa [#allocation5], 1 }

</bundles_post_ra>
